<compile_context>
chip_gen: v7x
topology: tpu7x:2x2x1
jax: 0.10.0
libtpu: 0.0.40
codegen_flags: <defaults>
</compile_context>

<pallas_src>
import functools
import math

import jax
import jax.numpy as jnp
from jax import lax
from jax.experimental import pallas as pl
from jax.experimental.pallas import tpu as pltpu

ALPHA = 3.0
GAMMA = 2.0
SMOOTH = 1e-6
LANE = 128
CHUNK_ROWS = 256        # per-chunk compute inside the kernel (128 KiB f32 slabs)
MAX_TILE_ROWS = 4096    # up to 2 MiB f32 per input block per pipeline buffer


def _round_up(n, m):
    return ((n + m - 1) // m) * m


def _focal_loss_elements(x, t, *, alpha, gamma, smooth, ignore_index):
    """Element-wise focal loss (shared by the kernel chunks and the JAX tail)."""
    x = x.astype(jnp.float32)
    t = t.astype(jnp.float32)

    # Shared transcendentals: one exp + one log (+ one divide) per element.
    e = jnp.exp(-jnp.abs(x))
    log1pe = jnp.log(1.0 + e)
    softplus_pos = jnp.maximum(x, 0.0) + log1pe    # softplus(x)  = -logsigmoid(-x)
    softplus_neg = jnp.maximum(-x, 0.0) + log1pe   # softplus(-x) = -logsigmoid(x)

    # NOTE: exact divide kept on purpose; pl.reciprocal(approx=True) would save
    # a few VALU ops but its error feeds prob**2 / (1-prob)**2 and would loosen
    # the match to the reference module.
    inv = 1.0 / (1.0 + e)
    prob = jnp.where(x >= 0.0, inv, e * inv)       # numerically stable sigmoid(x)
    prob = jnp.clip(prob, smooth, 1.0 - smooth)

    # log(clip(sigmoid(x), s, 1-s)) == clip(logsigmoid(x), log s, log(1-s)),
    # so the reference's clamp-then-log semantics are preserved.
    log_prob = jnp.clip(-softplus_neg, math.log(smooth), math.log1p(-smooth))

    pos_mask = (t == 1.0).astype(jnp.float32)
    neg_mask = (t == 0.0).astype(jnp.float32)
    if ignore_index is not None:
        valid = (t != float(ignore_index)).astype(jnp.float32)
        pos_mask = pos_mask * valid
        neg_mask = neg_mask * valid

    if gamma == 2:   # module default: squares on the VPU, no extra EUP work
        omp = 1.0 - prob
        pos_w = pos_mask * (omp * omp)
        neg_w = neg_mask * (prob * prob)
    else:            # prob is clipped away from {0,1}, so log is safe
        pos_w = pos_mask * jnp.exp(gamma * jnp.log(1.0 - prob))
        neg_w = neg_mask * jnp.exp(gamma * jnp.log(prob))

    # pos_loss + neg_loss of the reference module.
    return alpha * neg_w * softplus_pos - pos_w * log_prob


def _focal_kernel(x_ref, t_ref, psum_ref, acc_ref, *, alpha, gamma, smooth,
                  ignore_index, rows_total, tile_rows, chunk_rows,
                  blocks_per_core):
    c = pl.program_id(0)            # "parallel" (core) axis
    i = pl.program_id(1)            # "arbitrary" (reduction) axis

    @pl.when(i == 0)
    def _init():
        acc_ref[...] = jnp.zeros_like(acc_ref)

    blk = c * blocks_per_core + i                 # unclamped global block id
    valid_rows = rows_total - blk * tile_rows     # rows of this block inside array

    def block_sum(masked):
        nchunks = tile_rows // chunk_rows

        def body(j, acc):
            r0 = pl.multiple_of(j * chunk_rows, chunk_rows)
            x = x_ref[pl.ds(r0, chunk_rows), :]
            t = t_ref[pl.ds(r0, chunk_rows), :]
            loss = _focal_loss_elements(x, t, alpha=alpha, gamma=gamma,
                                        smooth=smooth, ignore_index=ignore_index)
            if masked:  # only traced for the boundary-block branch
                row = lax.broadcasted_iota(jnp.int32, loss.shape, 0) + r0
                loss = jnp.where(row < valid_rows, loss, 0.0)
            # Sublane-aligned partial reduction: pure VPU adds into one vreg.
            return acc + loss.reshape(chunk_rows // 8, 8, LANE).sum(axis=0)

        return lax.fori_loop(0, nchunks, body, jnp.zeros((8, LANE), jnp.float32))

    @pl.when(valid_rows >= tile_rows)             # interior block: mask-free
    def _full():
        acc_ref[...] += block_sum(masked=False)

    @pl.when((valid_rows > 0) & (valid_rows < tile_rows))   # boundary block
    def _partial():
        acc_ref[...] += block_sum(masked=True)

    # valid_rows <= 0 (clamped duplicate block on an odd split): skip compute.

    @pl.when(i == pl.num_programs(1) - 1)
    def _done():
        psum_ref[...] = acc_ref[...]              # full unmasked (8,128) store


def binary_focal_loss(output, target, *, alpha=ALPHA, gamma=GAMMA,
                      smooth=SMOOTH, ignore_index=None):
    """Matches BinaryFocalLoss(alpha, gamma, ignore_index).forward(output, target)."""
    assert output.shape == target.shape
    n_elem = output.size

    x = output.reshape(-1)
    t = target.reshape(-1)
    if t.dtype == jnp.bool_:
        t = t.astype(jnp.int8)          # bool blocks are awkward; int8 streams fine

    rows = n_elem // LANE
    rem = n_elem - rows * LANE

    total = jnp.zeros((), jnp.float32)
    if rem:
        # <=127-element lane-ragged tail: plain JAX instead of a whole-array pad.
        x_tail = lax.slice_in_dim(x, rows * LANE, n_elem)
        t_tail = lax.slice_in_dim(t, rows * LANE, n_elem)
        total = total + jnp.sum(_focal_loss_elements(
            x_tail, t_tail, alpha=float(alpha), gamma=gamma,
            smooth=float(smooth), ignore_index=ignore_index))
    if rows == 0:
        return total / jnp.float32(n_elem)

    if rem:
        x = lax.slice_in_dim(x, 0, rows * LANE)
        t = lax.slice_in_dim(t, 0, rows * LANE)
    x2 = x.reshape(rows, LANE)
    t2 = t.reshape(rows, LANE)

    # Row-block size: multiple of CHUNK_ROWS covering the array, capped at
    # MAX_TILE_ROWS (2 MiB f32 / input block so per-step DMA amortizes the
    # ~0.35us fixed grid-step overhead).  Multiples of 256 also satisfy the
    # (8|16|32, 128) native tiling of f32 / bf16 / int8 inputs.
    tile_rows = min(MAX_TILE_ROWS, _round_up(rows, CHUNK_ROWS))
    nb = pl.cdiv(rows, tile_rows)
    # The leading "parallel" axis only pays off on multi-TensorCore chips
    # (v7x); with a single block it would just duplicate work, so drop it.
    num_cores = 2 if nb >= 2 else 1
    bpc = pl.cdiv(nb, num_cores)

    def in_map(c, i):
        # Clamp so the (at most one) out-of-range grid point on an odd split
        # re-targets the last block; its compute is skipped inside the kernel.
        return (jnp.minimum(c * bpc + i, nb - 1), 0)

    kernel = functools.partial(
        _focal_kernel, alpha=float(alpha), gamma=gamma, smooth=float(smooth),
        ignore_index=ignore_index, rows_total=rows, tile_rows=tile_rows,
        chunk_rows=CHUNK_ROWS, blocks_per_core=bpc)

    partials = pl.pallas_call(
        kernel,
        out_shape=jax.ShapeDtypeStruct((num_cores * 8, LANE), jnp.float32),
        grid_spec=pltpu.PrefetchScalarGridSpec(
            num_scalar_prefetch=0,
            grid=(num_cores, bpc),
            in_specs=[
                pl.BlockSpec((tile_rows, LANE), in_map),
                pl.BlockSpec((tile_rows, LANE), in_map),
            ],
            out_specs=pl.BlockSpec((8, LANE), lambda c, i: (c, 0)),
            scratch_shapes=[pltpu.VMEM((8, LANE), jnp.float32)],
        ),
        compiler_params=pltpu.CompilerParams(
            dimension_semantics=("parallel", "arbitrary"),
            vmem_limit_bytes=48 * 1024 * 1024),
    )(x2, t2)

    total = total + jnp.sum(partials)
    # Reference module always returns loss.mean() over ALL elements.
    return total / jnp.float32(n_elem)


def _reference(output, target, alpha=ALPHA, gamma=GAMMA, smooth=SMOOTH,
               ignore_index=None):
    """Direct transcription of the PyTorch module in JAX (f32)."""
    output = output.astype(jnp.float32)
    target = target.astype(jnp.float32)
    prob = jnp.clip(jax.nn.sigmoid(output), smooth, 1.0 - smooth)
    pos_mask = (target == 1).astype(jnp.float32)
    neg_mask = (target == 0).astype(jnp.float32)
    if ignore_index is not None:
        valid = (target != ignore_index).astype(jnp.float32)
        pos_mask = pos_mask * valid
        neg_mask = neg_mask * valid
    pos_loss = -pos_mask * jnp.power(1.0 - prob, gamma) * jnp.log(prob)
    neg_loss = (-alpha * neg_mask * jnp.power(prob, gamma)
                * jax.nn.log_sigmoid(-output))
    return jnp.mean(pos_loss + neg_loss)


if __name__ == "__main__":
    root = jax.random.PRNGKey(0)
    keys = jax.random.split(root, 5)

    def check(key, shape, scale, x_dtype=jnp.float32, t_dtype=jnp.float32,
              n_classes=2, ignore_index=None):
        k1, k2 = jax.random.split(key)
        logits = (jax.random.normal(k1, shape, dtype=jnp.float32)
                  * scale).astype(x_dtype)
        tgt = jax.random.randint(k2, shape, 0, n_classes).astype(t_dtype)
        got = jax.block_until_ready(
            binary_focal_loss(logits, tgt, ignore_index=ignore_index))
        ref = _reference(logits, tgt, ignore_index=ignore_index)
        assert jnp.allclose(got, ref, rtol=5e-5, atol=1e-6), \
            (shape, float(got), float(ref))

    check(keys[0], (2, 4, 16, 16), 2.0)                       # spec-sized, single block
    check(keys[1], (3, 5, 7, 9), 20.0)                        # lane-ragged tail + clip path
    check(keys[2], (2, 4, 128, 160), 3.0,
          x_dtype=jnp.bfloat16, t_dtype=jnp.int8)             # narrow-dtype streaming
    check(keys[3], (1, 5, 1024, 128), 2.5)                    # 2 blocks: full + masked boundary, parallel axis
    check(keys[4], (2, 4, 16, 16), 2.0,
          n_classes=3, ignore_index=2)                        # ignore_index path
    print("KERNEL_OK")
</pallas_src>

<mosaic_0001>
module attributes {stable_mosaic.version = 11 : i64} {
  func.func @_focal_kernel(%arg0: i32, %arg1: i32, %arg2: memref<256x128xf32, #tpu.memory_space<vmem>>, %arg3: memref<256x128xf32, #tpu.memory_space<vmem>>, %arg4: memref<8x128xf32, #tpu.memory_space<vmem>>, %arg5: memref<8x128xf32, #tpu.memory_space<vmem>>) attributes {dimension_semantics = [#tpu.dimension_semantics<parallel>, #tpu.dimension_semantics<arbitrary>], iteration_bounds = array<i64: 1, 1>, scalar_prefetch = 0 : i64, scratch_operands = 1 : i64, tpu.core_type = #tpu.core_type<tc>, window_params = [{transform_indices = @transform_0, window_bounds = array<i64: 256, 128>}, {transform_indices = @transform_1, window_bounds = array<i64: 256, 128>}, {transform_indices = @transform_2, window_bounds = array<i64: 8, 128>}]} {
    %c0_i32 = arith.constant 0 : i32
    %0 = arith.cmpi eq, %arg1, %c0_i32 : i32
    %1 = arith.extui %0 : i1 to i32
    %c0_i32_0 = arith.constant 0 : i32
    %2 = arith.cmpi ne, %1, %c0_i32_0 : i32
    scf.if %2 {
      %cst = arith.constant 0.000000e+00 : f32
      %18 = vector.broadcast %cst : f32 to vector<8x128xf32>
      %c0 = arith.constant 0 : index
      %c0_8 = arith.constant 0 : index
      %19 = vector.load %arg5[%c0, %c0_8] : memref<8x128xf32, #tpu.memory_space<vmem>>, vector<8x128xf32>
      tpu.vector_store %arg5[%c0, %c0_8], %18 {strides = array<i32>} : memref<8x128xf32, #tpu.memory_space<vmem>>, vector<8x128xf32>,
    } else {
    }
    %c1_i32 = arith.constant 1 : i32
    %3 = arith.muli %arg0, %c1_i32 : i32
    %4 = arith.addi %3, %arg1 : i32
    %c256_i32 = arith.constant 256 : i32
    %5 = arith.muli %4, %c256_i32 : i32
    %c16_i32 = arith.constant 16 : i32
    %6 = arith.subi %c16_i32, %5 : i32
    %c256_i32_1 = arith.constant 256 : i32
    %7 = arith.cmpi sge, %6, %c256_i32_1 : i32
    %8 = arith.extui %7 : i1 to i32
    %c0_i32_2 = arith.constant 0 : i32
    %9 = arith.cmpi ne, %8, %c0_i32_2 : i32
    scf.if %9 {
      %c0 = arith.constant 0 : index
      %c0_8 = arith.constant 0 : index
      %18 = vector.load %arg5[%c0, %c0_8] : memref<8x128xf32, #tpu.memory_space<vmem>>, vector<8x128xf32>
      %cst = arith.constant 0.000000e+00 : f32
      %19 = vector.broadcast %cst : f32 to vector<8x128xf32>
      %c0_i32_9 = arith.constant 0 : i32
      %c256_i32_10 = arith.constant 256 : i32
      %20 = arith.muli %c0_i32_9, %c256_i32_10 : i32
      %21 = tpu.assume_multiple %20, 256 : i32
      %22 = arith.index_cast %21 : i32 to index
      %c0_11 = arith.constant 0 : index
      %23 = vector.load %arg2[%22, %c0_11] : memref<256x128xf32, #tpu.memory_space<vmem>>, vector<256x128xf32>
      %24 = arith.index_cast %21 : i32 to index
      %c0_12 = arith.constant 0 : index
      %25 = vector.load %arg3[%24, %c0_12] : memref<256x128xf32, #tpu.memory_space<vmem>>, vector<256x128xf32>
      %26 = math.absf %23 : vector<256x128xf32>
      %cst_13 = arith.constant 0.000000e+00 : f32
      %27 = vector.broadcast %cst_13 : f32 to vector<256x128xf32>
      %28 = arith.subf %27, %26 : vector<256x128xf32>
      %29 = math.exp %28 : vector<256x128xf32>
      %cst_14 = arith.constant 1.000000e+00 : f32
      %30 = vector.broadcast %cst_14 : f32 to vector<256x128xf32>
      %31 = arith.addf %30, %29 : vector<256x128xf32>
      %32 = math.log %31 : vector<256x128xf32>
      %cst_15 = arith.constant 0.000000e+00 : f32
      %33 = vector.broadcast %cst_15 : f32 to vector<256x128xf32>
      %34 = arith.maximumf %23, %33 : vector<256x128xf32>
      %35 = arith.addf %34, %32 : vector<256x128xf32>
      %cst_16 = arith.constant 0.000000e+00 : f32
      %36 = vector.broadcast %cst_16 : f32 to vector<256x128xf32>
      %37 = arith.subf %36, %23 : vector<256x128xf32>
      %cst_17 = arith.constant 0.000000e+00 : f32
      %38 = vector.broadcast %cst_17 : f32 to vector<256x128xf32>
      %39 = arith.maximumf %37, %38 : vector<256x128xf32>
      %40 = arith.addf %39, %32 : vector<256x128xf32>
      %cst_18 = arith.constant 1.000000e+00 : f32
      %41 = vector.broadcast %cst_18 : f32 to vector<256x128xf32>
      %42 = arith.addf %41, %29 : vector<256x128xf32>
      %cst_19 = arith.constant 1.000000e+00 : f32
      %43 = vector.broadcast %cst_19 : f32 to vector<256x128xf32>
      %44 = arith.divf %43, %42 : vector<256x128xf32>
      %cst_20 = arith.constant 0.000000e+00 : f32
      %45 = vector.broadcast %cst_20 : f32 to vector<256x128xf32>
      %46 = arith.cmpf oge, %23, %45 : vector<256x128xf32>
      %47 = arith.mulf %29, %44 : vector<256x128xf32>
      %48 = arith.select %46, %44, %47 : vector<256x128xi1>, vector<256x128xf32>
      %cst_21 = arith.constant 9.99999997E-7 : f32
      %cst_22 = arith.constant 0.999998986 : f32
      %49 = vector.broadcast %cst_21 : f32 to vector<256x128xf32>
      %50 = arith.maximumf %49, %48 : vector<256x128xf32>
      %51 = vector.broadcast %cst_22 : f32 to vector<256x128xf32>
      %52 = arith.minimumf %51, %50 : vector<256x128xf32>
      %cst_23 = arith.constant 0.000000e+00 : f32
      %53 = vector.broadcast %cst_23 : f32 to vector<256x128xf32>
      %54 = arith.subf %53, %40 : vector<256x128xf32>
      %cst_24 = arith.constant -13.8155107 : f32
      %cst_25 = arith.constant -1.00000045E-6 : f32
      %55 = vector.broadcast %cst_24 : f32 to vector<256x128xf32>
      %56 = arith.maximumf %55, %54 : vector<256x128xf32>
      %57 = vector.broadcast %cst_25 : f32 to vector<256x128xf32>
      %58 = arith.minimumf %57, %56 : vector<256x128xf32>
      %cst_26 = arith.constant 1.000000e+00 : f32
      %59 = vector.broadcast %cst_26 : f32 to vector<256x128xf32>
      %60 = arith.cmpf oeq, %25, %59 : vector<256x128xf32>
      %61 = arith.extui %60 : vector<256x128xi1> to vector<256x128xi32>
      %62 = arith.sitofp %61 : vector<256x128xi32> to vector<256x128xf32>
      %cst_27 = arith.constant 0.000000e+00 : f32
      %63 = vector.broadcast %cst_27 : f32 to vector<256x128xf32>
      %64 = arith.cmpf oeq, %25, %63 : vector<256x128xf32>
      %65 = arith.extui %64 : vector<256x128xi1> to vector<256x128xi32>
      %66 = arith.sitofp %65 : vector<256x128xi32> to vector<256x128xf32>
      %cst_28 = arith.constant 1.000000e+00 : f32
      %67 = vector.broadcast %cst_28 : f32 to vector<256x128xf32>
      %68 = arith.subf %67, %52 : vector<256x128xf32>
      %69 = arith.mulf %68, %68 : vector<256x128xf32>
      %70 = arith.mulf %62, %69 : vector<256x128xf32>
      %71 = arith.mulf %52, %52 : vector<256x128xf32>
      %72 = arith.mulf %66, %71 : vector<256x128xf32>
      %cst_29 = arith.constant 3.000000e+00 : f32
      %73 = vector.broadcast %cst_29 : f32 to vector<256x128xf32>
      %74 = arith.mulf %73, %72 : vector<256x128xf32>
      %75 = arith.mulf %74, %35 : vector<256x128xf32>
      %76 = arith.mulf %70, %58 : vector<256x128xf32>
      %77 = arith.subf %75, %76 : vector<256x128xf32>
      %78 = vector.shape_cast %77 : vector<256x128xf32> to vector<32x8x128xf32>
      %cst_30 = arith.constant dense<0.000000e+00> : vector<8x128xf32>
      %79 = vector.multi_reduction <add>, %78, %cst_30 [0] : vector<32x8x128xf32> to vector<8x128xf32>
      %80 = arith.addf %19, %79 : vector<8x128xf32>
      %c1_i32_31 = arith.constant 1 : i32
      %81 = arith.addf %18, %80 : vector<8x128xf32>
      %c0_32 = arith.constant 0 : index
      %c0_33 = arith.constant 0 : index
      %82 = vector.load %arg5[%c0_32, %c0_33] : memref<8x128xf32, #tpu.memory_space<vmem>>, vector<8x128xf32>
      tpu.vector_store %arg5[%c0_32, %c0_33], %81 {strides = array<i32>} : memref<8x128xf32, #tpu.memory_space<vmem>>, vector<8x128xf32>,
    } else {
    }
    %c0_i32_3 = arith.constant 0 : i32
    %10 = arith.cmpi sgt, %6, %c0_i32_3 : i32
    %c256_i32_4 = arith.constant 256 : i32
    %11 = arith.cmpi slt, %6, %c256_i32_4 : i32
    %12 = arith.andi %10, %11 : i1
    %13 = arith.extui %12 : i1 to i32
    %c0_i32_5 = arith.constant 0 : i32
    %14 = arith.cmpi ne, %13, %c0_i32_5 : i32
    scf.if %14 {
      %c0 = arith.constant 0 : index
      %c0_8 = arith.constant 0 : index
      %18 = vector.load %arg5[%c0, %c0_8] : memref<8x128xf32, #tpu.memory_space<vmem>>, vector<8x128xf32>
      %cst = arith.constant 0.000000e+00 : f32
      %19 = vector.broadcast %cst : f32 to vector<8x128xf32>
      %c0_i32_9 = arith.constant 0 : i32
      %c256_i32_10 = arith.constant 256 : i32
      %20 = arith.muli %c0_i32_9, %c256_i32_10 : i32
      %21 = tpu.assume_multiple %20, 256 : i32
      %22 = arith.index_cast %21 : i32 to index
      %c0_11 = arith.constant 0 : index
      %23 = vector.load %arg2[%22, %c0_11] : memref<256x128xf32, #tpu.memory_space<vmem>>, vector<256x128xf32>
      %24 = arith.index_cast %21 : i32 to index
      %c0_12 = arith.constant 0 : index
      %25 = vector.load %arg3[%24, %c0_12] : memref<256x128xf32, #tpu.memory_space<vmem>>, vector<256x128xf32>
      %26 = math.absf %23 : vector<256x128xf32>
      %cst_13 = arith.constant 0.000000e+00 : f32
      %27 = vector.broadcast %cst_13 : f32 to vector<256x128xf32>
      %28 = arith.subf %27, %26 : vector<256x128xf32>
      %29 = math.exp %28 : vector<256x128xf32>
      %cst_14 = arith.constant 1.000000e+00 : f32
      %30 = vector.broadcast %cst_14 : f32 to vector<256x128xf32>
      %31 = arith.addf %30, %29 : vector<256x128xf32>
      %32 = math.log %31 : vector<256x128xf32>
      %cst_15 = arith.constant 0.000000e+00 : f32
      %33 = vector.broadcast %cst_15 : f32 to vector<256x128xf32>
      %34 = arith.maximumf %23, %33 : vector<256x128xf32>
      %35 = arith.addf %34, %32 : vector<256x128xf32>
      %cst_16 = arith.constant 0.000000e+00 : f32
      %36 = vector.broadcast %cst_16 : f32 to vector<256x128xf32>
      %37 = arith.subf %36, %23 : vector<256x128xf32>
      %cst_17 = arith.constant 0.000000e+00 : f32
      %38 = vector.broadcast %cst_17 : f32 to vector<256x128xf32>
      %39 = arith.maximumf %37, %38 : vector<256x128xf32>
      %40 = arith.addf %39, %32 : vector<256x128xf32>
      %cst_18 = arith.constant 1.000000e+00 : f32
      %41 = vector.broadcast %cst_18 : f32 to vector<256x128xf32>
      %42 = arith.addf %41, %29 : vector<256x128xf32>
      %cst_19 = arith.constant 1.000000e+00 : f32
      %43 = vector.broadcast %cst_19 : f32 to vector<256x128xf32>
      %44 = arith.divf %43, %42 : vector<256x128xf32>
      %cst_20 = arith.constant 0.000000e+00 : f32
      %45 = vector.broadcast %cst_20 : f32 to vector<256x128xf32>
      %46 = arith.cmpf oge, %23, %45 : vector<256x128xf32>
      %47 = arith.mulf %29, %44 : vector<256x128xf32>
      %48 = arith.select %46, %44, %47 : vector<256x128xi1>, vector<256x128xf32>
      %cst_21 = arith.constant 9.99999997E-7 : f32
      %cst_22 = arith.constant 0.999998986 : f32
      %49 = vector.broadcast %cst_21 : f32 to vector<256x128xf32>
      %50 = arith.maximumf %49, %48 : vector<256x128xf32>
      %51 = vector.broadcast %cst_22 : f32 to vector<256x128xf32>
      %52 = arith.minimumf %51, %50 : vector<256x128xf32>
      %cst_23 = arith.constant 0.000000e+00 : f32
      %53 = vector.broadcast %cst_23 : f32 to vector<256x128xf32>
      %54 = arith.subf %53, %40 : vector<256x128xf32>
      %cst_24 = arith.constant -13.8155107 : f32
      %cst_25 = arith.constant -1.00000045E-6 : f32
      %55 = vector.broadcast %cst_24 : f32 to vector<256x128xf32>
      %56 = arith.maximumf %55, %54 : vector<256x128xf32>
      %57 = vector.broadcast %cst_25 : f32 to vector<256x128xf32>
      %58 = arith.minimumf %57, %56 : vector<256x128xf32>
      %cst_26 = arith.constant 1.000000e+00 : f32
      %59 = vector.broadcast %cst_26 : f32 to vector<256x128xf32>
      %60 = arith.cmpf oeq, %25, %59 : vector<256x128xf32>
      %61 = arith.extui %60 : vector<256x128xi1> to vector<256x128xi32>
      %62 = arith.sitofp %61 : vector<256x128xi32> to vector<256x128xf32>
      %cst_27 = arith.constant 0.000000e+00 : f32
      %63 = vector.broadcast %cst_27 : f32 to vector<256x128xf32>
      %64 = arith.cmpf oeq, %25, %63 : vector<256x128xf32>
      %65 = arith.extui %64 : vector<256x128xi1> to vector<256x128xi32>
      %66 = arith.sitofp %65 : vector<256x128xi32> to vector<256x128xf32>
      %cst_28 = arith.constant 1.000000e+00 : f32
      %67 = vector.broadcast %cst_28 : f32 to vector<256x128xf32>
      %68 = arith.subf %67, %52 : vector<256x128xf32>
      %69 = arith.mulf %68, %68 : vector<256x128xf32>
      %70 = arith.mulf %62, %69 : vector<256x128xf32>
      %71 = arith.mulf %52, %52 : vector<256x128xf32>
      %72 = arith.mulf %66, %71 : vector<256x128xf32>
      %cst_29 = arith.constant 3.000000e+00 : f32
      %73 = vector.broadcast %cst_29 : f32 to vector<256x128xf32>
      %74 = arith.mulf %73, %72 : vector<256x128xf32>
      %75 = arith.mulf %74, %35 : vector<256x128xf32>
      %76 = arith.mulf %70, %58 : vector<256x128xf32>
      %77 = arith.subf %75, %76 : vector<256x128xf32>
      %78 = tpu.iota {dimensions = array<i32: 0>} : vector<256x128xi32>
      %79 = vector.broadcast %21 : i32 to vector<256x128xi32>
      %80 = arith.addi %78, %79 : vector<256x128xi32>
      %81 = vector.broadcast %6 : i32 to vector<256x128xi32>
      %82 = arith.cmpi slt, %80, %81 : vector<256x128xi32>
      %cst_30 = arith.constant 0.000000e+00 : f32
      %83 = vector.broadcast %cst_30 : f32 to vector<256x128xf32>
      %84 = arith.select %82, %77, %83 : vector<256x128xi1>, vector<256x128xf32>
      %85 = vector.shape_cast %84 : vector<256x128xf32> to vector<32x8x128xf32>
      %cst_31 = arith.constant dense<0.000000e+00> : vector<8x128xf32>
      %86 = vector.multi_reduction <add>, %85, %cst_31 [0] : vector<32x8x128xf32> to vector<8x128xf32>
      %87 = arith.addf %19, %86 : vector<8x128xf32>
      %c1_i32_32 = arith.constant 1 : i32
      %88 = arith.addf %18, %87 : vector<8x128xf32>
      %c0_33 = arith.constant 0 : index
      %c0_34 = arith.constant 0 : index
      %89 = vector.load %arg5[%c0_33, %c0_34] : memref<8x128xf32, #tpu.memory_space<vmem>>, vector<8x128xf32>
      tpu.vector_store %arg5[%c0_33, %c0_34], %88 {strides = array<i32>} : memref<8x128xf32, #tpu.memory_space<vmem>>, vector<8x128xf32>,
    } else {
    }
    %c0_i32_6 = arith.constant 0 : i32
    %15 = arith.cmpi eq, %arg1, %c0_i32_6 : i32
    %16 = arith.extui %15 : i1 to i32
    %c0_i32_7 = arith.constant 0 : i32
    %17 = arith.cmpi ne, %16, %c0_i32_7 : i32
    scf.if %17 {
      %c0 = arith.constant 0 : index
      %c0_8 = arith.constant 0 : index
      %18 = vector.load %arg5[%c0, %c0_8] : memref<8x128xf32, #tpu.memory_space<vmem>>, vector<8x128xf32>
      %c0_9 = arith.constant 0 : index
      %c0_10 = arith.constant 0 : index
      %19 = vector.load %arg4[%c0_9, %c0_10] : memref<8x128xf32, #tpu.memory_space<vmem>>, vector<8x128xf32>
      tpu.vector_store %arg4[%c0_9, %c0_10], %18 {strides = array<i32>} : memref<8x128xf32, #tpu.memory_space<vmem>>, vector<8x128xf32>,
    } else {
    }
    return
  }
  func.func @transform_0(%arg0: i32, %arg1: i32) -> (i32, i32) {
    %c1_i32 = arith.constant 1 : i32
    %0 = arith.muli %arg0, %c1_i32 : i32
    %1 = arith.addi %0, %arg1 : i32
    %c0_i32 = arith.constant 0 : i32
    %2 = arith.minsi %1, %c0_i32 : i32
    %c0_i32_0 = arith.constant 0 : i32
    %c0_i32_1 = arith.constant 0 : i32
    return %2, %c0_i32_0 : i32, i32
  }
  func.func @transform_1(%arg0: i32, %arg1: i32) -> (i32, i32) {
    %c1_i32 = arith.constant 1 : i32
    %0 = arith.muli %arg0, %c1_i32 : i32
    %1 = arith.addi %0, %arg1 : i32
    %c0_i32 = arith.constant 0 : i32
    %2 = arith.minsi %1, %c0_i32 : i32
    %c0_i32_0 = arith.constant 0 : i32
    %c0_i32_1 = arith.constant 0 : i32
    return %2, %c0_i32_0 : i32, i32
  }
  func.func @transform_2(%arg0: i32, %arg1: i32) -> (i32, i32) {
    %c0_i32 = arith.constant 0 : i32
    %c0_i32_0 = arith.constant 0 : i32
    return %arg0, %c0_i32 : i32, i32
  }
}

</mosaic_0001>

<bundles_post_ra>
// kernel: tpu_custom_call.1
= control target key start
LH: loop header
LB: loop body
LE: loop exit
PB: predicated region body
PF: predicated region fallthrough
CT: control target
= control target key end

     0   :  { %7 = vsyncpa [#allocation4], 0  ;;  %s3093_s0 = inlined_call_operand.hbm [shape: f32[16,128], index: 0, kind: input, shape index: {}]   ;;  %s3094_s1 = inlined_call_operand.hbm [shape: f32[16,128], index: 1, kind: input, shape index: {}]   ;;  %s3095_s2 = inlined_call_operand.hbm [shape: f32[8,128], index: 2, kind: output, shape index: {}]  }
   0x1   :  { %8 = vsyncpa [#allocation7], 0 }
   0x2   :  { %9 = vsyncpa [#allocation5], 0 }
   0x3   :  { %20 = vsyncadd [#allocation4], 3840  ;;  %s3030_s9 = smov [#allocation3]   ;;  %s2958_s13 = scalar_lea.hbm %s3093_s0, 256 }
   0x4   :  { %s25_s10 = sshll.u32 %s3030_s9, 4  ;;  %p2959_p0 = scmp.ne.s32.totalorder %s3093_s0, %s2958_s13  ;;  %s26_s10 = int_to_ptr.vmem [resolvable:$true] %s25_s10 }
   0x5   :  { %p2962_p1 = scmp.lt.u32.totalorder %s2958_s13, %s3093_s0 }
   0x7   :  { %p2964_p2 = pnand %p2962_p1, %p2959_p0 }
   0x9   :  { %2967 = shalt.err (!%p2964_p2)
}
   0xa   :  { %s2968_s18 = scalar_lea.vmem %s26_s10, 256  ;;  %s2972_s19 = scalar_lea.vmem %s26_s10, 4096 }
   0xb   :  { %p2969_p3 = scmp.ne.s32.totalorder %s26_s10, %s2968_s18  ;;  %p2973_p4 = scmp.lt.s32.totalorder %s26_s10, %s26_s10 }
   0xc   :  { %p2974_p5 = scmp.lt.s32.totalorder %s2972_s19, %s2968_s18 }
   0xe   :  { %p2975_p6 = por %p2974_p5, %p2973_p4 }
  0x10   :  { %p2976_p7 = pnand %p2975_p6, %p2969_p3 }
  0x12   :  { %2979 = shalt.err (!%p2976_p7)
}
  0x13   :  { %s3031_s20 = smov 128   ;;  %s3032_s21 = smov 8  }
  0x14   :  { %31 = dma.hbm_to_vmem [thread:$0]  %s3093_s0, 256, %s26_s10, [#allocation4], %s3031_s20, %s3031_s20, %s3032_s21  }
  0x15   :  { %42 = vsyncadd [#allocation7], 3840  ;;  %s3033_s24 = smov [#allocation6]   ;;  %s2980_s28 = scalar_lea.hbm %s3094_s1, 256 }
  0x16   :  { %s47_s25 = sshll.u32 %s3033_s24, 4  ;;  %p2981_p8 = scmp.ne.s32.totalorder %s3094_s1, %s2980_s28  ;;  %s48_s25 = int_to_ptr.vmem [resolvable:$true] %s47_s25 }
  0x17   :  { %p2984_p9 = scmp.lt.u32.totalorder %s2980_s28, %s3094_s1 }
  0x19   :  { %p2986_p10 = pnand %p2984_p9, %p2981_p8 }
  0x1b   :  { %2989 = shalt.err (!%p2986_p10)
}
  0x1c   :  { %s2990_s5 = scalar_lea.vmem %s48_s25, 256  ;;  %s2994_s0 = scalar_lea.vmem %s48_s25, 4096 }
  0x1d   :  { %p2991_p11 = scmp.ne.s32.totalorder %s48_s25, %s2990_s5  ;;  %p2995_p12 = scmp.lt.s32.totalorder %s48_s25, %s48_s25 }
  0x1e   :  { %p2996_p13 = scmp.lt.s32.totalorder %s2994_s0, %s2990_s5 }
  0x20   :  { %p2997_p0 = por %p2996_p13, %p2995_p12 }
  0x22   :  { %p2998_p1 = pnand %p2997_p0, %p2991_p11 }
  0x24   :  { %3001 = shalt.err (!%p2998_p1)
}
  0x25   :  { %53 = dma.hbm_to_vmem [thread:$0]  %s3094_s1, 256, %s48_s25, [#allocation7], %s3031_s20, %s3031_s20, %s3032_s21  }
  0x26   :  { %3024 = dma.done.wait [#allocation4], 4096  }
  0x27   :  { %3025 = vsyncadd [#allocation4], 4294963200 }
  0x28   :  { %3026 = dma.done.wait [#allocation7], 4096  }
  0x29   :  { %3027 = vsyncadd [#allocation7], 4294963200  ;;  %v1374_v0 = vld [vmem:[#allocation3] sm:$0xff]  ;;  %v3075_v1 = vld [vmem:[#allocation3 + $0x8] sm:$0xff]  ;;  %v3034_v40 = vmov 0.0   ;;  %s3035_s1 = smov [#allocation8]  }
  0x2a   :  { %v1438_v2 = vand.u32 2147483647, %v1374_v0  ;;  %v1439_v3 = vand.u32 2147483647, %v3075_v1  ;;  %v1726_v12 = vsub.f32 0.0, %v1374_v0  ;;  %v1727_v13 = vsub.f32 0.0, %v3075_v1 }
  0x2b   :  { %vm1886_vm0 = vcmp.ge.f32.partialorder %v1374_v0, 0.0  ;;  %v1406_v22 = vld [vmem:[#allocation6] sm:$0xff]  ;;  %vm1887_vm1 = vcmp.ge.f32.partialorder %v3075_v1, 0.0  ;;  %v1407_v25 = vld [vmem:[#allocation6 + $0x8] sm:$0xff]  ;;  %v1662_v33 = vmax.f32 %v1374_v0, 0.0  ;;  %v1663_v37 = vmax.f32 %v3075_v1, 0.0 }
  0x2c   :  { %v1470_v4 = vsub.f32 0.0, %v1438_v2  ;;  %v1471_v5 = vsub.f32 0.0, %v1439_v3  ;;  %v1758_v14 = vmax.f32 %v1726_v12, 0.0  ;;  %v1759_v16 = vmax.f32 %v1727_v13, 0.0  ;;  %s2798_s8 = sshll.u32 %s3035_s1, 4  ;;  %s2799_s8 = int_to_ptr.vmem [resolvable:$true] %s2798_s8 }
  0x2d   :  { %vm2238_vm2 = vcmp.eq.f32.partialorder %v1406_v22, 0.0  ;;  %vm2239_vm3 = vcmp.eq.f32.partialorder %v1407_v25, 0.0  ;;  %vm2142_vm4 = vcmp.eq.f32.partialorder %v1406_v22, 1.0  ;;  %vm2143_vm5 = vcmp.eq.f32.partialorder %v1407_v25, 1.0  ;;  %s3002_s9 = scalar_lea.vmem %s2799_s8, 128  ;;  %p3007_p3 = scmp.lt.s32.totalorder %s2799_s8, %s2799_s8 }
  0x2e   :  { %v1502_v6 = vmul.f32 1.442695, %v1470_v4  ;;  %v1504_v7 = vmul.f32 1.442695, %v1471_v5  ;;  %v2908_v41 = vsel %vm2238_vm2, 1.0, %v3034_v40  ;;  %v2909_v42 = vsel %vm2239_vm3, 1.0, %v3034_v40  ;;  %p3003_p2 = scmp.ne.s32.totalorder %s2799_s8, %s3002_s9  ;;  %p3008_p4 = scmp.lt.s32.totalorder %s3002_s9, %s3002_s9 }
  0x2f   :  { %v2876_v45 = vsel %vm2142_vm4, 1.0, %v3034_v40  ;;  %v2877_v46 = vsel %vm2143_vm5, 1.0, %v3034_v40 }
  0x30   :  { %2946 = vpow2.f32 %v1502_v6  ;;  %p3009_p5 = por %p3008_p4, %p3007_p3 }
  0x31   :  { %2948 = vpow2.f32 %v1504_v7 }
  0x32   :  { %p3010_p6 = pnand %p3009_p5, %p3003_p2 }
  0x3a   :  { %v2947_v8 = vpop.eup %2946 }
  0x3b   :  { %v2949_v9 = vpop.eup %2948  ;;  %v1566_v10 = vadd.f32 1.0, %v2947_v8 }
  0x3c   :  { %v1567_v11 = vadd.f32 1.0, %v2949_v9 }
  0x3d   :  { %2950 = vlog2.f32 %v1566_v10 }
  0x3e   :  { %2952 = vlog2.f32 %v1567_v11 }
  0x3f   :  { %2954 = vrcp.f32 %v1566_v10 }
  0x40   :  { %2956 = vrcp.f32 %v1567_v11 }
  0x47   :  { %v2951_v15 = vpop.eup %2950 }
  0x48   :  { %v2953_v17 = vpop.eup %2952  ;;  %v1599_v18 = vmul.f32 0.6931472, %v2951_v15 }
  0x49   :  { %v2955_v19 = vpop.eup %2954  ;;  %v1601_v20 = vmul.f32 0.6931472, %v2953_v17 }
  0x4a   :  { %v2957_v21 = vpop.eup %2956  ;;  %v1790_v23 = vadd.f32 %v1758_v14, %v1599_v18  ;;  %v1918_v24 = vmul.f32 %v2955_v19, %v2947_v8  ;;  %v1694_v49 = vadd.f32 %v1662_v33, %v1599_v18 }
  0x4b   :  { %v1791_v26 = vadd.f32 %v1759_v16, %v1601_v20  ;;  %v1919_v27 = vmul.f32 %v2957_v21, %v2949_v9  ;;  %v1695_v53 = vadd.f32 %v1663_v37, %v1601_v20 }
  0x4c   :  { %v1950_v28 = vsel %vm1886_vm0, %v2955_v19, %v1918_v24  ;;  %v2046_v29 = vsub.f32 0.0, %v1790_v23 }
  0x4d   :  { %v1951_v30 = vsel %vm1887_vm1, %v2957_v21, %v1919_v27  ;;  %v1982_v31 = vmax.f32 %v1950_v28, 1e-06  ;;  %v2047_v32 = vsub.f32 0.0, %v1791_v26 }
  0x4e   :  { %v1983_v34 = vmax.f32 %v1951_v30, 1e-06  ;;  %v2078_v36 = vmax.f32 %v2046_v29, -13.815511 }
  0x4f   :  { %v2014_v35 = vmin.f32 %v1982_v31, 0.999999  ;;  %v2079_v39 = vmax.f32 %v2047_v32, -13.815511 }
  0x50   :  { %v2015_v38 = vmin.f32 %v1983_v34, 0.999999  ;;  %v2110_v50 = vmin.f32 %v2078_v36, -1.0000005e-06 }
  0x51   :  { %v2334_v43 = vsub.f32 1.0, %v2014_v35  ;;  %v2430_v44 = vmul.f32 %v2014_v35, %v2014_v35  ;;  %v2111_v54 = vmin.f32 %v2079_v39, -1.0000005e-06 }
  0x52   :  { %v2335_v47 = vsub.f32 1.0, %v2015_v38  ;;  %v2431_v48 = vmul.f32 %v2015_v38, %v2015_v38 }
  0x53   :  { %v2366_v51 = vmul.f32 %v2334_v43, %v2334_v43  ;;  %v2462_v52 = vmul.f32 %v2908_v41, %v2430_v44 }
  0x54   :  { %v2367_v55 = vmul.f32 %v2335_v47, %v2335_v47  ;;  %v2463_v56 = vmul.f32 %v2909_v42, %v2431_v48 }
  0x55   :  { %v2398_v57 = vmul.f32 %v2876_v45, %v2366_v51  ;;  %v2494_v58 = vmul.f32 3.0, %v2462_v52 }
  0x56   :  { %v2399_v59 = vmul.f32 %v2877_v46, %v2367_v55  ;;  %v2495_v60 = vmul.f32 3.0, %v2463_v56 }
  0x57   :  { %v2526_v61 = vmul.f32 %v2494_v58, %v1694_v49  ;;  %v2558_v62 = vmul.f32 %v2398_v57, %v2110_v50 }
  0x58   :  { %v2527_v63 = vmul.f32 %v2495_v60, %v1695_v53  ;;  %v2559_v0 = vmul.f32 %v2399_v59, %v2111_v54 }
  0x59   :  { %v2590_v1 = vsub.f32 %v2526_v61, %v2558_v62 }
  0x5a   :  { %v2591_v2 = vsub.f32 %v2527_v63, %v2559_v0 }
  0x5c   :  { %v2753_v3 = vadd.f32 %v2591_v2, %v2590_v1 }
  0x5e   :  { %2791 = vst [vmem:[#allocation8] sm:$0xff] %v2753_v3 }
  0x5f   :  { %3013 = shalt.err (!%p3010_p6)
}
  0x60   :  { %s3014_s12 = scalar_lea.hbm %s3095_s2, 128 }
  0x61   :  { %p3015_p7 = scmp.ne.s32.totalorder %s3095_s2, %s3014_s12  ;;  %p3018_p8 = scmp.lt.u32.totalorder %s3014_s12, %s3095_s2 }
  0x63   :  { %p3020_p9 = pnand %p3018_p8, %p3015_p7 }
  0x65   :  { %3023 = shalt.err (!%p3020_p9)
}
  0x66   :  { %2801 = dma.vmem_to_hbm [thread:$0]  %s2799_s8, 128, %s3095_s2, [#allocation5]  }
  0x67   :  { %3028 = dma.done.wait [#allocation5], 128  }
  0x68   :  { %3029 = vsyncadd [#allocation5], 4294967168 }
  0x69   :  { %2805 = vsyncpa [#allocation4], 1 }
  0x6a   :  { %2806 = vsyncpa [#allocation7], 1 }
  0x6b   :  { %2807 = vsyncpa [#allocation5], 1 }

</bundles_post_ra>
